<compile_context>
chip_gen: v7x
topology: tpu7x:2x2x1
jax: 0.10.0
libtpu: 0.0.40
codegen_flags: <defaults>
</compile_context>

<pallas_src>
import math

import jax
import jax.numpy as jnp
from jax.experimental import pallas as pl
from jax.experimental.pallas import tpu as pltpu


def _round_up(v, m):
    return ((v + m - 1) // m) * m


def _vmem_budget_bytes():
    """Per-TensorCore VMEM capacity minus headroom for Mosaic internal scratch."""
    try:
        cap = int(pltpu.get_tpu_info().vmem_capacity_bytes)
    except Exception:
        cap = 64 * 2**20  # conservative fallback (v7x per-core VMEM)
    return cap - 8 * 2**20


def _matmul_kernel(x_ref, w_ref, o_ref, acc_ref):
    """One (tm, tk) x (tk, tn) MXU step, f32 accumulation over the K grid axis."""

    @pl.when(pl.program_id(2) == 0)
    def _init():
        acc_ref[...] = jnp.zeros_like(acc_ref)

    acc_ref[...] += jnp.dot(
        x_ref[...], w_ref[...], preferred_element_type=jnp.float32
    )

    @pl.when(pl.program_id(2) == pl.num_programs(2) - 1)
    def _finalize():
        o_ref[...] = acc_ref[...].astype(o_ref.dtype)


def decoder_network(x, w_kn, *, tm_max=1024, tn_max=512, force_pallas=False):
    """y = x @ w_kn  (nn.Linear with bias=False; w_kn = weight.T, shape (in, out))."""
    K = x.shape[-1]
    assert w_kn.shape[0] == K, "w_kn must be (in_channels, out_channels)"
    N = w_kn.shape[1]

    lead_shape = x.shape[:-1]
    M = math.prod(lead_shape)
    out_dtype = x.dtype
    x2d = x.reshape(M, K)

    # Tiny problems: pallas_call fixed cost dominates — plain XLA is faster.
    if not force_pallas and 2 * M * N * K < (1 << 21):
        y = jnp.dot(x2d, w_kn, preferred_element_type=jnp.float32).astype(out_dtype)
        return y.reshape(*lead_shape, N)

    # NOTE: x and w_kn should share a dtype; jnp.dot promotes in-kernel otherwise.
    x_item = x2d.dtype.itemsize
    w_item = w_kn.dtype.itemsize
    o_item = jnp.dtype(out_dtype).itemsize

    # dtype-native sublane multiple: 8 rows (f32), 16 (bf16), 32 (int8/fp8).
    sub = max(8, 32 // x_item)

    # ---- Tile selection -------------------------------------------------------------
    # Full-extent blocks whenever a dim fits under its cap (always layout-legal, no
    # masking); otherwise 128/256-multiple tiles with a masked ragged tail block.
    tm = M if M <= tm_max else tm_max          # tm_max is a multiple of 256
    tn = N if N <= tn_max else tn_max          # tn_max is a multiple of 128
    tk = K                                     # K only gets tiled if VMEM demands it

    # K tile candidates: multiples of 128 that divide K exactly.  Never mask K —
    # garbage in a partially-masked contraction tile would pollute valid outputs.
    tk_opts = [K] + [c for c in (4096, 2048, 1024, 512, 256, 128)
                     if c < K and K % c == 0]

    def working_set(tm_, tn_, tk_):
        # Conservative: double-buffered x/w/out tiles + the f32 accumulator scratch.
        return (2 * tm_ * tk_ * x_item + 2 * tk_ * tn_ * w_item
                + 2 * tm_ * tn_ * o_item + tm_ * tn_ * 4)

    budget = _vmem_budget_bytes()
    while working_set(tm, tn, tk) > budget:
        smaller_tk = next((c for c in tk_opts if c < tk), None)
        if smaller_tk is not None:
            tk = smaller_tk        # shrinking K tile does not change HBM traffic
        elif tn > 128:
            tn = max(128, _round_up(tn // 2, 128))
        elif tm > sub:
            tm = max(sub, _round_up(tm // 2, sub))
        else:
            # TODO(synk): K too large and not 128-divisible to tile cleanly.
            break

    grid_m = pl.cdiv(M, tm)
    grid_n = pl.cdiv(N, tn)
    grid_k = pl.cdiv(K, tk)

    # Give v7x's second TensorCore work when the grid would be a single block.
    if grid_m == 1 and grid_n == 1 and grid_k == 1 and M >= 512:
        tm = min(tm, _round_up(pl.cdiv(M, 2), 128))
        grid_m = pl.cdiv(M, tm)

    # ---- VMEM request ----------------------------------------------------------------
    ws = working_set(tm, tn, tk)
    vmem_limit = int(min(budget, max(ws + (4 << 20), 32 << 20)))

    # ---- Grid-axis order: re-stream whichever operand costs fewer HBM bytes -----------
    w_bytes = N * K * w_item
    x_bytes = M * K * x_item
    m_outer = grid_m * w_bytes <= grid_n * x_bytes
    if m_outer:       # weight re-streamed grid_m times, x streamed once (typical decode)
        grid = (grid_m, grid_n, grid_k)
        x_map = lambda i, j, k: (i, k)
        w_map = lambda i, j, k: (k, j)
        o_map = lambda i, j, k: (i, j)
    else:             # weight resident, x re-streamed (large-M prefill vs. big head)
        grid = (grid_n, grid_m, grid_k)
        x_map = lambda j, i, k: (i, k)
        w_map = lambda j, i, k: (k, j)
        o_map = lambda j, i, k: (i, j)

    out2d = pl.pallas_call(
        _matmul_kernel,
        out_shape=jax.ShapeDtypeStruct((M, N), out_dtype),
        grid_spec=pltpu.PrefetchScalarGridSpec(
            num_scalar_prefetch=0,
            grid=grid,
            in_specs=[
                pl.BlockSpec((tm, tk), x_map),   # activations tile
                pl.BlockSpec((tk, tn), w_map),   # weight tile, (K, N) layout
            ],
            out_specs=pl.BlockSpec((tm, tn), o_map),
            scratch_shapes=[pltpu.VMEM((tm, tn), jnp.float32)],
        ),
        compiler_params=pltpu.CompilerParams(
            dimension_semantics=("parallel", "parallel", "arbitrary"),
            vmem_limit_bytes=vmem_limit,
        ),
        cost_estimate=pl.CostEstimate(
            flops=2 * M * N * K,
            transcendentals=0,
            bytes_accessed=x_bytes + w_bytes + M * N * o_item,
        ),
    )(x2d, w_kn)

    return out2d.reshape(*lead_shape, N)


class DecoderNetwork:
    """Mirrors the PyTorch module: y = x @ W.T with W of shape (out, in), bias=False.

    The weight is transposed to (in, out) ONCE at construction so the per-call path
    never materializes a transposed / padded copy of the weight in HBM.
    """

    def __init__(self, weight_oi):
        self.w_kn = jnp.transpose(jnp.asarray(weight_oi))  # (in, out), materialized once

    def __call__(self, x, **kwargs):
        return decoder_network(x, self.w_kn, **kwargs)


if __name__ == "__main__":
    key = jax.random.PRNGKey(0)
    kx, kw, kx2, kw3, kx3 = jax.random.split(key, 5)

    # --- Small shapes consistent with the module: batch=2, seq=8, in=32, out=64 -------
    batch, seq, in_ch, out_ch = 2, 8, 32, 64
    x = jax.random.normal(kx, (batch, seq, in_ch), dtype=jnp.float32)
    weight = jax.random.normal(kw, (out_ch, in_ch), dtype=jnp.float32) / jnp.sqrt(in_ch)

    dec = DecoderNetwork(weight)
    ref = jnp.einsum("bsi,oi->bso", x, weight)

    out_fast = dec(x)                        # tiny problem -> XLA fallback path
    out_pallas = dec(x, force_pallas=True)   # force the Pallas kernel path
    jax.block_until_ready((out_fast, out_pallas))
    assert out_fast.shape == (batch, seq, out_ch)
    assert jnp.allclose(out_fast, ref, atol=1e-5, rtol=1e-5)
    assert jnp.allclose(out_pallas, ref, atol=1e-5, rtol=1e-5)

    # --- Ragged leading dims (batch*seq = 21): full-extent single-block path ----------
    x2 = jax.random.normal(kx2, (3, 7, in_ch), dtype=jnp.float32)
    out2 = dec(x2, force_pallas=True)
    jax.block_until_ready(out2)
    ref2 = jnp.einsum("bsi,oi->bso", x2, weight)
    assert out2.shape == (3, 7, out_ch)
    assert jnp.allclose(out2, ref2, atol=1e-5, rtol=1e-5)

    # --- Moderate shape: multi-block grid, masked ragged M tail, resident weight ------
    in3, out3, seq3 = 256, 384, 300
    w3 = jax.random.normal(kw3, (out3, in3), dtype=jnp.float32) / jnp.sqrt(in3)
    x3 = jax.random.normal(kx3, (2, seq3, in3), dtype=jnp.float32)
    dec3 = DecoderNetwork(w3)
    out3_ = dec3(x3)
    jax.block_until_ready(out3_)
    ref3 = jnp.einsum("bsi,oi->bso", x3, w3)
    assert out3_.shape == (2, seq3, out3)
    assert jnp.allclose(out3_, ref3, atol=2e-2, rtol=2e-2)  # loose: MXU precision mode

    print("KERNEL_OK")
</pallas_src>

<mosaic_0001>
module attributes {stable_mosaic.version = 11 : i64} {
  func.func @_matmul_kernel(%arg0: i32, %arg1: i32, %arg2: i32, %arg3: memref<16x32xf32, #tpu.memory_space<vmem>>, %arg4: memref<32x64xf32, #tpu.memory_space<vmem>>, %arg5: memref<16x64xf32, #tpu.memory_space<vmem>>, %arg6: memref<16x64xf32, #tpu.memory_space<vmem>>) attributes {dimension_semantics = [#tpu.dimension_semantics<parallel>, #tpu.dimension_semantics<parallel>, #tpu.dimension_semantics<arbitrary>], iteration_bounds = array<i64: 1, 1, 1>, scalar_prefetch = 0 : i64, scratch_operands = 1 : i64, tpu.core_type = #tpu.core_type<tc>, window_params = [{transform_indices = @transform_0, window_bounds = array<i64: 16, 32>}, {transform_indices = @transform_1, window_bounds = array<i64: 32, 64>}, {transform_indices = @transform_2, window_bounds = array<i64: 16, 64>}]} {
    %c0_i32 = arith.constant 0 : i32
    %0 = arith.cmpi eq, %arg2, %c0_i32 : i32
    %1 = arith.extui %0 : i1 to i32
    %c0_i32_0 = arith.constant 0 : i32
    %2 = arith.cmpi ne, %1, %c0_i32_0 : i32
    scf.if %2 {
      %cst_10 = arith.constant 0.000000e+00 : f32
      %12 = vector.broadcast %cst_10 : f32 to vector<16x64xf32>
      %c0_11 = arith.constant 0 : index
      %c0_12 = arith.constant 0 : index
      %13 = vector.load %arg6[%c0_11, %c0_12] : memref<16x64xf32, #tpu.memory_space<vmem>>, vector<16x64xf32>
      tpu.vector_store %arg6[%c0_11, %c0_12], %12 {strides = array<i32>} : memref<16x64xf32, #tpu.memory_space<vmem>>, vector<16x64xf32>,
    } else {
    }
    %c0 = arith.constant 0 : index
    %c0_1 = arith.constant 0 : index
    %3 = vector.load %arg6[%c0, %c0_1] : memref<16x64xf32, #tpu.memory_space<vmem>>, vector<16x64xf32>
    %c0_2 = arith.constant 0 : index
    %c0_3 = arith.constant 0 : index
    %4 = vector.load %arg3[%c0_2, %c0_3] : memref<16x32xf32, #tpu.memory_space<vmem>>, vector<16x32xf32>
    %c0_4 = arith.constant 0 : index
    %c0_5 = arith.constant 0 : index
    %5 = vector.load %arg4[%c0_4, %c0_5] : memref<32x64xf32, #tpu.memory_space<vmem>>, vector<32x64xf32>
    %cst = arith.constant dense<0.000000e+00> : vector<16x64xf32>
    %6 = tpu.matmul %4, %5, %cst {dimension_numbers = #tpu.dot_dimension_numbers<[1], [0], [0], [1], [0, 0, 1, 1], [], []>} : vector<16x32xf32>, vector<32x64xf32>, vector<16x64xf32> -> vector<16x64xf32>
    %7 = arith.addf %3, %6 : vector<16x64xf32>
    %c0_6 = arith.constant 0 : index
    %c0_7 = arith.constant 0 : index
    %8 = vector.load %arg6[%c0_6, %c0_7] : memref<16x64xf32, #tpu.memory_space<vmem>>, vector<16x64xf32>
    tpu.vector_store %arg6[%c0_6, %c0_7], %7 {strides = array<i32>} : memref<16x64xf32, #tpu.memory_space<vmem>>, vector<16x64xf32>,
    %c0_i32_8 = arith.constant 0 : i32
    %9 = arith.cmpi eq, %arg2, %c0_i32_8 : i32
    %10 = arith.extui %9 : i1 to i32
    %c0_i32_9 = arith.constant 0 : i32
    %11 = arith.cmpi ne, %10, %c0_i32_9 : i32
    scf.if %11 {
      %c0_10 = arith.constant 0 : index
      %c0_11 = arith.constant 0 : index
      %12 = vector.load %arg6[%c0_10, %c0_11] : memref<16x64xf32, #tpu.memory_space<vmem>>, vector<16x64xf32>
      %c0_12 = arith.constant 0 : index
      %c0_13 = arith.constant 0 : index
      %13 = vector.load %arg5[%c0_12, %c0_13] : memref<16x64xf32, #tpu.memory_space<vmem>>, vector<16x64xf32>
      tpu.vector_store %arg5[%c0_12, %c0_13], %12 {strides = array<i32>} : memref<16x64xf32, #tpu.memory_space<vmem>>, vector<16x64xf32>,
    } else {
    }
    return
  }
  func.func @transform_0(%arg0: i32, %arg1: i32, %arg2: i32) -> (i32, i32) {
    %c0_i32 = arith.constant 0 : i32
    return %arg1, %arg2 : i32, i32
  }
  func.func @transform_1(%arg0: i32, %arg1: i32, %arg2: i32) -> (i32, i32) {
    %c0_i32 = arith.constant 0 : i32
    return %arg2, %arg0 : i32, i32
  }
  func.func @transform_2(%arg0: i32, %arg1: i32, %arg2: i32) -> (i32, i32) {
    %c0_i32 = arith.constant 0 : i32
    return %arg1, %arg0 : i32, i32
  }
}

</mosaic_0001>

<bundles_post_ra>
// kernel: tpu_custom_call.1
= control target key start
LH: loop header
LB: loop body
LE: loop exit
PB: predicated region body
PF: predicated region fallthrough
CT: control target
= control target key end

     0   :  { %7 = vsyncpa [#allocation4], 0  ;;  %s344_s0 = inlined_call_operand.hbm [shape: f32[16,32], index: 0, kind: input, shape index: {}]   ;;  %s345_s1 = inlined_call_operand.hbm [shape: f32[32,64], index: 1, kind: input, shape index: {}]   ;;  %s346_s2 = inlined_call_operand.hbm [shape: f32[16,64], index: 2, kind: output, shape index: {}]  }
   0x1   :  { %8 = vsyncpa [#allocation7], 0 }
   0x2   :  { %9 = vsyncpa [#allocation5], 0  ;;  %s272_s9 = smov [#allocation3]   ;;  %s200_s13 = scalar_lea.hbm %s344_s0, 256 }
   0x3   :  { %s15_s10 = sshll.u32 %s272_s9, 4  ;;  %p201_p0 = scmp.ne.s32.totalorder %s344_s0, %s200_s13  ;;  %s16_s10 = int_to_ptr.vmem [resolvable:$true] %s15_s10 }
   0x4   :  { %p204_p1 = scmp.lt.u32.totalorder %s200_s13, %s344_s0 }
   0x6   :  { %p206_p2 = pnand %p204_p1, %p201_p0 }
   0x8   :  { %209 = shalt.err (!%p206_p2)
}
   0x9   :  { %s210_s18 = scalar_lea.vmem %s16_s10, 256  ;;  %p215_p4 = scmp.lt.s32.totalorder %s16_s10, %s16_s10 }
   0xa   :  { %p211_p3 = scmp.ne.s32.totalorder %s16_s10, %s210_s18  ;;  %p216_p5 = scmp.lt.s32.totalorder %s210_s18, %s210_s18 }
   0xc   :  { %p217_p6 = por %p216_p5, %p215_p4 }
   0xe   :  { %p218_p7 = pnand %p217_p6, %p211_p3 }
  0x10   :  { %221 = shalt.err (!%p218_p7)
}
  0x11   :  { %s273_s19 = smov 128   ;;  %s274_s20 = smov 8  }
  0x12   :  { %21 = dma.hbm_to_vmem [thread:$0]  %s344_s0, 256, %s16_s10, [#allocation4], %s273_s19, %s273_s19, %s274_s20  }
  0x13   :  { %s275_s23 = smov [#allocation6]   ;;  %s222_s27 = scalar_lea.hbm %s345_s1, 512 }
  0x14   :  { %s27_s24 = sshll.u32 %s275_s23, 4  ;;  %p223_p8 = scmp.ne.s32.totalorder %s345_s1, %s222_s27  ;;  %s28_s24 = int_to_ptr.vmem [resolvable:$true] %s27_s24 }
  0x15   :  { %p226_p9 = scmp.lt.u32.totalorder %s222_s27, %s345_s1 }
  0x17   :  { %p228_p10 = pnand %p226_p9, %p223_p8 }
  0x19   :  { %231 = shalt.err (!%p228_p10)
}
  0x1a   :  { %s232_s4 = scalar_lea.vmem %s28_s24, 512  ;;  %p237_p12 = scmp.lt.s32.totalorder %s28_s24, %s28_s24 }
  0x1b   :  { %p233_p11 = scmp.ne.s32.totalorder %s28_s24, %s232_s4  ;;  %p238_p13 = scmp.lt.s32.totalorder %s232_s4, %s232_s4 }
  0x1d   :  { %p239_p0 = por %p238_p13, %p237_p12 }
  0x1f   :  { %p240_p1 = pnand %p239_p0, %p233_p11 }
  0x21   :  { %243 = shalt.err (!%p240_p1)
}
  0x22   :  { %33 = dma.hbm_to_vmem [thread:$0]  %s345_s1, 512, %s28_s24, [#allocation7], %s273_s19, %s273_s19, %s274_s20  }
  0x23   :  { %266 = dma.done.wait [#allocation4], 256  }
  0x24   :  { %267 = vsyncadd [#allocation4], 4294967040 }
  0x25   :  { %268 = dma.done.wait [#allocation7], 512  }
  0x26   :  { %269 = vsyncadd [#allocation7], 4294966784  ;;  %vm44_vm0 = vcmask 523264   ;;  %v276_v0 = vmov 0.0   ;;  %vm55_vm1 = vcmask 261120   ;;  %v51_v1 = vld [vmem:[#allocation6] sm:$0xff] }
  0x27   :  { %46 = vst.msk [vmem:[#allocation2 + $0x8] sm:$0xff] %vm44_vm0, %v276_v0  ;;  %45 = vst.msk [vmem:[#allocation2] sm:$0xff] %vm44_vm0, %v276_v0  ;;  %v52_v2 = vld [vmem:[#allocation6 + $0x8] sm:$0xff]  ;;  %v53_v3 = vld [vmem:[#allocation6 + $0x10] sm:$0xff]  ;;  %s277_s1 = smov [#allocation8]  }
  0x28   :  { %v186_v4 = vpack.c.bf16 %v52_v2, %v51_v1  ;;  %v54_v5 = vld [vmem:[#allocation6 + $0x18] sm:$0xff]  ;;  %v49_v6 = vld [vmem:[#allocation3] sm:$0xff]  ;;  %s154_s6 = sshll.u32 %s277_s1, 4  ;;  %s155_s6 = int_to_ptr.vmem [resolvable:$true] %s154_s6 }
  0x29   :  { %v190_v7 = vpack.c.bf16 %v54_v5, %v53_v3  ;;  %183 = vmatprep.mubr.msk.f32.mxu0 %vm55_vm1, %v49_v6  ;;  %v50_v8 = vld [vmem:[#allocation3 + $0x8] sm:$0xff]  ;;  %s244_s7 = scalar_lea.vmem %s155_s6, 256  ;;  %p249_p3 = scmp.lt.s32.totalorder %s155_s6, %s155_s6 }
  0x2a   :  { %187 = vmatprep.subr.bf16.mxu0 %v186_v4  ;;  %p245_p2 = scmp.ne.s32.totalorder %s155_s6, %s244_s7  ;;  %p250_p4 = scmp.lt.s32.totalorder %s244_s7, %s244_s7 }
  0x2b   :  { %189 = vmatpush3.bf16.msra.mxu0 %v186_v4 }
  0x2c   :  { %191 = vmatprep.subr.bf16.mxu0 %v190_v7  ;;  %p251_p5 = por %p250_p4, %p249_p3 }
  0x2e   :  { %v48_v9 = vld [vmem:[#allocation2 + $0x8] sm:$0xff]  ;;  %v47_v10 = vld [vmem:[#allocation2] sm:$0xff]  ;;  %p252_p6 = pnand %p251_p5, %p245_p2 }
  0x2f   :  { %193 = vmatpush3.bf16.msra.mxu0 %v190_v7 }
  0x32   :  { %184 = vmatmul.mubr.msk.f32.vlgmr.msra.gmra.mrb[0].mxu0 %vm55_vm1, %v50_v8 }
 0x105   :  { %v185_v11 = vpop.f32.mrb[0].mxu0 }
 0x106   :  { %v138_v12 = vadd.f32 %v185_v11, %v48_v9  ;;  %v128_v13 = vpop.f32.mrb[1].mxu0 }
 0x107   :  { %v137_v14 = vadd.f32 %v128_v13, %v47_v10 }
 0x108   :  { %141 = vst.msk [vmem:[#allocation2 + $0x8] sm:$0xff] %vm44_vm0, %v138_v12 }
 0x109   :  { %140 = vst.msk [vmem:[#allocation2] sm:$0xff] %vm44_vm0, %v137_v14 }
 0x10f   :  { %v146_v15 = vld [vmem:[#allocation2 + $0x8] sm:$0xff] }
 0x110   :  { %v145_v16 = vld [vmem:[#allocation2] sm:$0xff]  ;;  %148 = vst.msk [vmem:[#allocation8 + $0x8] sm:$0xff] %vm44_vm0, %v146_v15 }
 0x111   :  { %147 = vst.msk [vmem:[#allocation8] sm:$0xff] %vm44_vm0, %v145_v16 }
 0x112   :  { %255 = shalt.err (!%p252_p6)
}
 0x113   :  { %s256_s10 = scalar_lea.hbm %s346_s2, 256 }
 0x114   :  { %p257_p7 = scmp.ne.s32.totalorder %s346_s2, %s256_s10  ;;  %p260_p8 = scmp.lt.u32.totalorder %s256_s10, %s346_s2 }
 0x116   :  { %p262_p9 = pnand %p260_p8, %p257_p7 }
 0x118   :  { %265 = shalt.err (!%p262_p9)
}
 0x119   :  { %160 = dma.vmem_to_hbm [thread:$0]  %s155_s6, 256, %s346_s2, [#allocation5], %s273_s19, %s273_s19, %s274_s20  }
 0x11a   :  { %270 = dma.done.wait [#allocation5], 256  }
 0x11b   :  { %271 = vsyncadd [#allocation5], 4294967040 }
 0x11c   :  { %164 = vsyncpa [#allocation4], 1 }
 0x11d   :  { %165 = vsyncpa [#allocation7], 1 }
 0x11e   :  { %166 = vsyncpa [#allocation5], 1 }

</bundles_post_ra>
